<compile_context>
chip_gen: v6e
topology: v6e:2x2x1
jax: 0.10.0
libtpu: 0.0.40
codegen_flags: <defaults>
</compile_context>

<pallas_src>
import functools
import math

import jax
import jax.numpy as jnp
from jax.experimental import pallas as pl
from jax.experimental.pallas import tpu as pltpu

_BN_EPS = 1e-5


def _round_up(x, m):
    return ((x + m - 1) // m) * m


def _pick_row_tile(m, cap=1024):
    """Pick a row tile: largest multiple-of-8 divisor of m (<= cap) -> no padding.

    Returns (tile, padded_m)."""
    c = min(cap, m)
    start = c - (c % 8)
    for d in range(start, 7, -8):
        if m % d == 0:
            return d, m
    if m <= cap:
        return m, m                      # full-dim block (always a legal block shape)
    mp = _round_up(m, 512)
    return 512, mp                       # rare fallback: minimal zero padding


def _fold_factor(m, c):
    """Fold several rows into the lane axis when channels are narrow (C | 128)."""
    if c >= 128 or 128 % c != 0:
        return 1
    f = 128 // c
    while f > 1 and m % f != 0:
        f //= 2
    return f


# --------------------------------------------------------------------------
# GEMM + bias (single K step, bf16 operands, f32 accumulation on the MXU)
# --------------------------------------------------------------------------
def _gemm_kernel(a_ref, b_ref, bias_ref, o_ref):
    acc = jnp.dot(a_ref[...], b_ref[...], preferred_element_type=jnp.float32)
    o_ref[...] = (acc + bias_ref[...]).astype(o_ref.dtype)


@functools.lru_cache(maxsize=None)
def _build_gemm(Mp, K, Np, tm, tn):
    grid = (Mp // tm, Np // tn)
    f = pl.pallas_call(
        _gemm_kernel,
        out_shape=jax.ShapeDtypeStruct((Mp, Np), jnp.bfloat16),
        grid_spec=pltpu.PrefetchScalarGridSpec(
            num_scalar_prefetch=0,
            grid=grid,
            in_specs=[pl.BlockSpec((tm, K), lambda i, j: (i, 0)),
                      pl.BlockSpec((K, tn), lambda i, j: (0, j)),
                      pl.BlockSpec((1, tn), lambda i, j: (0, j))],
            out_specs=pl.BlockSpec((tm, tn), lambda i, j: (i, j))),
        compiler_params=pltpu.CompilerParams(
            dimension_semantics=("parallel", "parallel")),
    )
    return jax.jit(f)


def _gemm_tiles(M, K, Np):
    if Np <= 512:
        tn = Np
    elif Np % 256 == 0:
        tn = 256
    else:
        tn = 128
    cap = 512
    while cap > 128:
        # bf16 double-buffered A, B, out tiles must sit comfortably in scoped VMEM
        vmem = 2 * 2 * (cap * K + K * tn + cap * tn)
        if vmem <= 24 * 1024 * 1024:
            break
        cap //= 2
    tm, Mp = _pick_row_tile(M, cap)
    return tm, Mp, tn


def matmul_bias(a, b, bias):
    """(M,K)@(K,N)+bias on the MXU; bf16 operands, f32 accumulation, bf16 output."""
    M, K = a.shape
    _, N = b.shape
    Np = _round_up(N, 128)
    tm, Mp, tn = _gemm_tiles(M, K, Np)
    a16 = a.astype(jnp.bfloat16)
    if Mp != M:
        a16 = jnp.pad(a16, ((0, Mp - M), (0, 0)))
    b16 = jnp.pad(b.astype(jnp.bfloat16), ((0, 0), (0, Np - N)))
    biasp = jnp.pad(bias.astype(jnp.float32), (0, Np - N))[None, :]
    out = _build_gemm(Mp, K, Np, tm, tn)(a16, b16, biasp)
    if Mp != M or Np != N:
        out = out[:M, :N]
    return out


# --------------------------------------------------------------------------
# Temporal (k,1,1) conv: taps as an "arbitrary" grid axis (no im2col at all)
# --------------------------------------------------------------------------
@functools.lru_cache(maxsize=None)
def _build_tconv(N, Dp, Do, HW, C, Np, tn, kd, sd):
    def kernel(x_ref, w_ref, bias_ref, o_ref, acc_ref):
        dz = pl.program_id(3)

        @pl.when(dz == 0)
        def _():
            acc_ref[...] = jnp.zeros_like(acc_ref)

        acc_ref[...] += jnp.dot(x_ref[0, 0], w_ref[0],
                                preferred_element_type=jnp.float32)

        @pl.when(dz == kd - 1)
        def _():
            o_ref[0, 0] = (acc_ref[...] + bias_ref[...]).astype(o_ref.dtype)

    grid = (N, Do, Np // tn, kd)
    f = pl.pallas_call(
        kernel,
        out_shape=jax.ShapeDtypeStruct((N, Do, HW, Np), jnp.bfloat16),
        grid_spec=pltpu.PrefetchScalarGridSpec(
            num_scalar_prefetch=0,
            grid=grid,
            in_specs=[
                pl.BlockSpec((1, 1, HW, C),
                             lambda n, d, j, dz: (n, d * sd + dz, 0, 0)),
                pl.BlockSpec((1, C, tn), lambda n, d, j, dz: (dz, 0, j)),
                pl.BlockSpec((1, tn), lambda n, d, j, dz: (0, j)),
            ],
            out_specs=pl.BlockSpec((1, 1, HW, tn),
                                   lambda n, d, j, dz: (n, d, 0, j)),
            scratch_shapes=[pltpu.VMEM((HW, tn), jnp.float32)]),
        compiler_params=pltpu.CompilerParams(
            dimension_semantics=("parallel", "parallel", "parallel", "arbitrary")),
    )
    return jax.jit(f)


def conv_temporal(x, w, b, sd, pd):
    """x: (N,D,H,W,Cin) bf16; w: (kd,Cin,Cout); stride (sd,1,1), padding (pd,0,0)."""
    kd, cin, cout = w.shape
    N, D, H, W, _ = x.shape
    if pd:
        x = jnp.pad(x, ((0, 0), (pd, pd), (0, 0), (0, 0), (0, 0)))
    Dp = D + 2 * pd
    Do = (Dp - kd) // sd + 1

    if kd == 1:  # pure channel mix (downsample path): strided slice + one GEMM
        xs = x[:, 0:(Do - 1) * sd + 1:sd]
        M = N * Do * H * W
        out = matmul_bias(xs.reshape(M, cin), w[0], b)
        return out.reshape(N, Do, H, W, cout)

    HW = H * W
    Np = _round_up(cout, 128)
    tn = Np if Np <= 512 else (256 if Np % 256 == 0 else 128)
    x4 = x.reshape(N, Dp, HW, cin).astype(jnp.bfloat16)
    w16 = jnp.pad(w.astype(jnp.bfloat16), ((0, 0), (0, 0), (0, Np - cout)))
    biasp = jnp.pad(b.astype(jnp.float32), (0, Np - cout))[None, :]
    out = _build_tconv(N, Dp, Do, HW, cin, Np, tn, kd, sd)(x4, w16, biasp)
    if Np != cout:
        out = out[..., :cout]
    return out.reshape(N, Do, H, W, cout)


# --------------------------------------------------------------------------
# Spatial (1,k,k) conv: bf16 im2col + GEMM
# TODO(synk): fold the (dy,dx) spatial taps into the GEMM grid (like the temporal
# conv) to remove the remaining k*k patch materialization in HBM.
# --------------------------------------------------------------------------
def conv_spatial(x, w, b, stride, padding):
    """x: (N,D,H,W,Cin) bf16; w: (kh,kw,Cin,Cout); stride (1,sh,sw), pad (0,ph,pw)."""
    kh, kw, cin, cout = w.shape
    sh, sw = stride
    ph, pw = padding
    N, D, H, W, _ = x.shape
    if ph or pw:
        x = jnp.pad(x, ((0, 0), (0, 0), (ph, ph), (pw, pw), (0, 0)))
    Hp, Wp = H + 2 * ph, W + 2 * pw
    Ho = (Hp - kh) // sh + 1
    Wo = (Wp - kw) // sw + 1

    cols = []
    for dy in range(kh):
        for dx in range(kw):
            cols.append(x[:, :,
                          dy:dy + (Ho - 1) * sh + 1:sh,
                          dx:dx + (Wo - 1) * sw + 1:sw, :])
    patches = cols[0] if len(cols) == 1 else jnp.concatenate(cols, axis=-1)
    K = kh * kw * cin
    M = N * D * Ho * Wo
    out = matmul_bias(patches.reshape(M, K).astype(jnp.bfloat16),
                      w.reshape(K, cout), b)
    return out.reshape(N, D, Ho, Wo, cout)


# --------------------------------------------------------------------------
# BatchNorm3d (batch statistics) + fused affine(+residual)(+ReLU) apply
# --------------------------------------------------------------------------
@functools.lru_cache(maxsize=None)
def _build_bn_stats(Mp, Cf, tm):
    def kernel(x_ref, s_ref, ss_ref):
        @pl.when(pl.program_id(0) == 0)
        def _():
            s_ref[...] = jnp.zeros_like(s_ref)
            ss_ref[...] = jnp.zeros_like(ss_ref)

        x = x_ref[...].astype(jnp.float32)
        s_ref[...] += jnp.sum(x, axis=0, keepdims=True)
        ss_ref[...] += jnp.sum(x * x, axis=0, keepdims=True)

    f = pl.pallas_call(
        kernel,
        out_shape=(jax.ShapeDtypeStruct((1, Cf), jnp.float32),
                   jax.ShapeDtypeStruct((1, Cf), jnp.float32)),
        grid_spec=pltpu.PrefetchScalarGridSpec(
            num_scalar_prefetch=0,
            grid=(Mp // tm,),
            in_specs=[pl.BlockSpec((tm, Cf), lambda i: (i, 0))],
            out_specs=(pl.BlockSpec((1, Cf), lambda i: (0, 0)),
                       pl.BlockSpec((1, Cf), lambda i: (0, 0)))),
        compiler_params=pltpu.CompilerParams(dimension_semantics=("arbitrary",)),
    )
    return jax.jit(f)


@functools.lru_cache(maxsize=None)
def _build_affine_apply(Mp, Cf, tm, two_inputs, relu):
    def kernel(*refs):
        if two_inputs:
            a_ref, b_ref, sa_ref, ba_ref, sb_ref, bb_ref, o_ref = refs
        else:
            a_ref, sa_ref, ba_ref, o_ref = refs
        y = a_ref[...].astype(jnp.float32) * sa_ref[...] + ba_ref[...]
        if two_inputs:
            y = y + b_ref[...].astype(jnp.float32) * sb_ref[...] + bb_ref[...]
        if relu:
            y = jnp.maximum(y, 0.0)
        o_ref[...] = y.astype(o_ref.dtype)

    n_vec = 2 if two_inputs else 1
    in_specs = [pl.BlockSpec((tm, Cf), lambda i: (i, 0)) for _ in range(n_vec)]
    in_specs += [pl.BlockSpec((1, Cf), lambda i: (0, 0)) for _ in range(2 * n_vec)]
    f = pl.pallas_call(
        kernel,
        out_shape=jax.ShapeDtypeStruct((Mp, Cf), jnp.bfloat16),
        grid_spec=pltpu.PrefetchScalarGridSpec(
            num_scalar_prefetch=0,
            grid=(Mp // tm,),
            in_specs=in_specs,
            out_specs=pl.BlockSpec((tm, Cf), lambda i: (i, 0))),
        compiler_params=pltpu.CompilerParams(dimension_semantics=("parallel",)),
    )
    return jax.jit(f)


def _bn_scale_shift(x, gamma, beta):
    """Per-channel (scale, shift) from training-mode batch statistics of x (NDHWC)."""
    N, D, H, W, C = x.shape
    M = N * D * H * W
    f = _fold_factor(M, C)
    Mf, Cf = M // f, C * f
    xf = x.reshape(Mf, Cf)
    tm, Mp = _pick_row_tile(Mf, cap=2048)
    if Mp != Mf:
        xf = jnp.pad(xf, ((0, Mp - Mf), (0, 0)))   # zero rows do not change the sums
    s, ss = _build_bn_stats(Mp, Cf, tm)(xf)
    s = s.reshape(f, C).sum(0)
    ss = ss.reshape(f, C).sum(0)
    mean = s / M
    # TODO(synk): E[x^2]-E[x]^2 in f32 can cancel for large-magnitude activations;
    # switch to a centered second reduction pass if needed.
    var = jnp.maximum(ss / M - mean * mean, 0.0)
    scale = gamma.astype(jnp.float32) * jax.lax.rsqrt(var + _BN_EPS)
    shift = beta.astype(jnp.float32) - mean * scale
    return scale, shift


def _affine_apply(a, scale_a, shift_a, b=None, scale_b=None, shift_b=None, relu=True):
    """y = a*scale_a+shift_a [+ b*scale_b+shift_b], optional ReLU, tiled over rows."""
    N, D, H, W, C = a.shape
    M = N * D * H * W
    f = _fold_factor(M, C)
    Mf, Cf = M // f, C * f
    tm, Mp = _pick_row_tile(Mf, cap=2048)
    pad = Mp != Mf

    def prep_mat(t):
        t = t.reshape(Mf, Cf)
        if pad:
            t = jnp.pad(t, ((0, Mp - Mf), (0, 0)))
        return t

    def prep_vec(v):
        v = v.astype(jnp.float32)
        if f > 1:
            v = jnp.tile(v, f)
        return v[None, :]

    args = [prep_mat(a)]
    if b is not None:
        args.append(prep_mat(b))
    args += [prep_vec(scale_a), prep_vec(shift_a)]
    if b is not None:
        args += [prep_vec(scale_b), prep_vec(shift_b)]

    y = _build_affine_apply(Mp, Cf, tm, b is not None, relu)(*args)
    if pad:
        y = y[:Mf]
    return y.reshape(N, D, H, W, C)


def batchnorm_relu(x, gamma, beta, relu=True):
    scale, shift = _bn_scale_shift(x, gamma, beta)
    return _affine_apply(x, scale, shift, relu=relu)


# --------------------------------------------------------------------------
# SpatioTemporalConv / ResBlock / ResLayer
# --------------------------------------------------------------------------
def _conv_init(key, shape, fan_in):
    wk, bk = jax.random.split(key)
    bound = 1.0 / math.sqrt(fan_in)
    w = jax.random.uniform(wk, shape, jnp.float32, -bound, bound)
    b = jax.random.uniform(bk, (shape[-1],), jnp.float32, -bound, bound)
    return w, b


def stconv_params(key, cin, cout, ksize, stride, padding):
    kd, kh, kw = ksize
    mid = int(math.floor(kd * kh * kw * cin * cout /
                         (kh * kw * cin + kd * cout)))
    mid = max(mid, 1)
    ks, kt = jax.random.split(key)
    w_s, b_s = _conv_init(ks, (kh, kw, cin, mid), kh * kw * cin)
    w_t, b_t = _conv_init(kt, (kd, mid, cout), kd * mid)
    return {
        'w_s': w_s, 'b_s': b_s,
        'gamma': jnp.ones((mid,), jnp.float32),
        'beta': jnp.zeros((mid,), jnp.float32),
        'w_t': w_t, 'b_t': b_t,
        'stride': tuple(stride), 'padding': tuple(padding),
    }


def stconv_forward(p, x):
    sd, sh, sw = p['stride']
    pd, ph, pw = p['padding']
    x = conv_spatial(x, p['w_s'], p['b_s'], (sh, sw), (ph, pw))   # 2D spatial conv
    x = batchnorm_relu(x, p['gamma'], p['beta'], relu=True)       # bn + relu (task 0)
    x = conv_temporal(x, p['w_t'], p['b_t'], sd, pd)              # 1D temporal conv
    return x


def block_params(key, cin, cout, k, downsample):
    k1, k2, kd_ = jax.random.split(key, 3)
    pad = k // 2
    p = {'downsample': downsample}
    if downsample:
        p['dconv'] = stconv_params(kd_, cin, cout, (1, 1, 1), (2, 2, 2), (0, 0, 0))
        p['dbn_gamma'] = jnp.ones((cout,), jnp.float32)
        p['dbn_beta'] = jnp.zeros((cout,), jnp.float32)
        p['conv1'] = stconv_params(k1, cin, cout, (k, k, k), (2, 2, 2),
                                   (pad, pad, pad))
    else:
        p['conv1'] = stconv_params(k1, cin, cout, (k, k, k), (1, 1, 1),
                                   (pad, pad, pad))
    p['bn1_gamma'] = jnp.ones((cout,), jnp.float32)
    p['bn1_beta'] = jnp.zeros((cout,), jnp.float32)
    p['conv2'] = stconv_params(k2, cout, cout, (k, k, k), (1, 1, 1),
                               (pad, pad, pad))
    p['bn2_gamma'] = jnp.ones((cout,), jnp.float32)
    p['bn2_beta'] = jnp.zeros((cout,), jnp.float32)
    return p


def block_forward(p, x):
    res = stconv_forward(p['conv1'], x)
    res = batchnorm_relu(res, p['bn1_gamma'], p['bn1_beta'], relu=True)
    res = stconv_forward(p['conv2'], res)
    # Fused: out = relu( bn2(res) + skip_affine(skip) )  -- one HBM pass.
    scale2, shift2 = _bn_scale_shift(res, p['bn2_gamma'], p['bn2_beta'])
    if p['downsample']:
        skip = stconv_forward(p['dconv'], x)
        skip_scale, skip_shift = _bn_scale_shift(skip, p['dbn_gamma'], p['dbn_beta'])
    else:
        skip = x
        c = x.shape[-1]
        skip_scale = jnp.ones((c,), jnp.float32)
        skip_shift = jnp.zeros((c,), jnp.float32)
    return _affine_apply(res, scale2, shift2, skip, skip_scale, skip_shift, relu=True)


def res_layer_params(key, cin, cout, k, layer_size, downsample):
    keys = jax.random.split(key, layer_size)
    blocks = [block_params(keys[0], cin, cout, k, downsample)]
    for i in range(1, layer_size):
        blocks.append(block_params(keys[i], cout, cout, k, False))
    return blocks


def res_layer_forward(blocks, x_ncdhw):
    # NCDHW at the interface -> NDHWC bf16 internally.
    x = jnp.transpose(x_ncdhw, (0, 2, 3, 4, 1)).astype(jnp.bfloat16)
    for bp in blocks:
        x = block_forward(bp, x)
    return jnp.transpose(x, (0, 4, 1, 2, 3)).astype(jnp.float32)


if __name__ == "__main__":
    key = jax.random.PRNGKey(0)
    pkey, xkey = jax.random.split(key)
    # TODO(synk): MultiBatchNorm holds `tasks` identical BN layers; task index 0
    # (default current_bn_layer) with training-mode batch statistics is used here.
    in_c, out_c, ksize, layer_size, downsample = 8, 16, 3, 2, True
    params = res_layer_params(pkey, in_c, out_c, ksize, layer_size, downsample)
    # (N, C, T, H, W) video clip, as the PyTorch module expects.
    x = jax.random.normal(xkey, (2, in_c, 4, 16, 16), jnp.float32)
    out = res_layer_forward(params, x)
    out = jax.block_until_ready(out)
    assert out.shape == (2, out_c, 2, 8, 8), out.shape
    assert bool(jnp.all(jnp.isfinite(out)))
    print("KERNEL_OK")
</pallas_src>

<mosaic_0001>
module attributes {stable_mosaic.version = 11 : i64} {
  func.func @_gemm_kernel(%arg0: i32, %arg1: i32, %arg2: memref<512x72xbf16, #tpu.memory_space<vmem>>, %arg3: memref<72x128xbf16, #tpu.memory_space<vmem>>, %arg4: memref<1x128xf32, #tpu.memory_space<vmem>>, %arg5: memref<512x128xbf16, #tpu.memory_space<vmem>>) attributes {dimension_semantics = [#tpu.dimension_semantics<parallel>, #tpu.dimension_semantics<parallel>], iteration_bounds = array<i64: 1, 1>, scalar_prefetch = 0 : i64, scratch_operands = 0 : i64, tpu.core_type = #tpu.core_type<tc>, window_params = [{transform_indices = @transform_0, window_bounds = array<i64: 512, 72>}, {transform_indices = @transform_1, window_bounds = array<i64: 72, 128>}, {transform_indices = @transform_2, window_bounds = array<i64: 1, 128>}, {transform_indices = @transform_3, window_bounds = array<i64: 512, 128>}]} {
    %c0 = arith.constant 0 : index
    %c0_0 = arith.constant 0 : index
    %0 = vector.load %arg2[%c0, %c0_0] : memref<512x72xbf16, #tpu.memory_space<vmem>>, vector<512x72xbf16>
    %c0_1 = arith.constant 0 : index
    %c0_2 = arith.constant 0 : index
    %1 = vector.load %arg3[%c0_1, %c0_2] : memref<72x128xbf16, #tpu.memory_space<vmem>>, vector<72x128xbf16>
    %cst = arith.constant dense<0.000000e+00> : vector<512x128xf32>
    %2 = tpu.matmul %0, %1, %cst {dimension_numbers = #tpu.dot_dimension_numbers<[1], [0], [0], [1], [0, 0, 1, 1], [], []>} : vector<512x72xbf16>, vector<72x128xbf16>, vector<512x128xf32> -> vector<512x128xf32>
    %c0_3 = arith.constant 0 : index
    %c0_4 = arith.constant 0 : index
    %3 = vector.load %arg4[%c0_3, %c0_4] : memref<1x128xf32, #tpu.memory_space<vmem>>, vector<1x128xf32>
    %4 = vector.broadcast %3 : vector<1x128xf32> to vector<512x128xf32>
    %5 = arith.addf %2, %4 : vector<512x128xf32>
    %6 = arith.truncf %5 : vector<512x128xf32> to vector<512x128xbf16>
    %c0_5 = arith.constant 0 : index
    %c0_6 = arith.constant 0 : index
    %7 = vector.load %arg5[%c0_5, %c0_6] : memref<512x128xbf16, #tpu.memory_space<vmem>>, vector<512x128xbf16>
    tpu.vector_store %arg5[%c0_5, %c0_6], %6 {strides = array<i32>} : memref<512x128xbf16, #tpu.memory_space<vmem>>, vector<512x128xbf16>,
    return
  }
  func.func @transform_0(%arg0: i32, %arg1: i32) -> (i32, i32) {
    %c0_i32 = arith.constant 0 : i32
    %c0_i32_0 = arith.constant 0 : i32
    return %arg0, %c0_i32 : i32, i32
  }
  func.func @transform_1(%arg0: i32, %arg1: i32) -> (i32, i32) {
    %c0_i32 = arith.constant 0 : i32
    %c0_i32_0 = arith.constant 0 : i32
    return %c0_i32, %arg1 : i32, i32
  }
  func.func @transform_2(%arg0: i32, %arg1: i32) -> (i32, i32) {
    %c0_i32 = arith.constant 0 : i32
    %c0_i32_0 = arith.constant 0 : i32
    return %c0_i32, %arg1 : i32, i32
  }
  func.func @transform_3(%arg0: i32, %arg1: i32) -> (i32, i32) {
    %c0_i32 = arith.constant 0 : i32
    return %arg0, %arg1 : i32, i32
  }
}

</mosaic_0001>

<bundles_post_ra>
// kernel: tpu_custom_call.1
= control target key start
LH: loop header
LB: loop body
LE: loop exit
PB: predicated region body
PF: predicated region fallthrough
CT: control target
= control target key end

     0   :  { %vm380_vm0 = vcmask 1043456   ;;  %vm283_vm1 = vcmask 588800   ;;  %s1821_s0 = inlined_call_operand.vmem [shape: bf16[512,72], index: 0, kind: input, shape index: {}]   ;;  %s1822_s1 = inlined_call_operand.vmem [shape: bf16[72,128], index: 1, kind: input, shape index: {}]   ;;  %s1823_s2 = inlined_call_operand.vmem [shape: f32[1,128], index: 2, kind: input, shape index: {}]   ;;  %s1824_s3 = inlined_call_operand.hbm [shape: bf16[512,128], index: 3, kind: output, shape index: {}]  }
   0x1   :  { %v1524_v0 = vld [vmem:[%s1822_s1 + $0x20] ss:$0 sps:$4 sm:$0xff]   ;;  %v1525_v1 = vld [vmem:[%s1822_s1 + $0x18] sm:$0xff]   ;;  %v1526_v3 = vld [vmem:[%s1822_s1 + $0x10] sm:$0xff]  }
   0x2   :  { %1519 = vmatprep.subr.msk.bf16.mxu0 %vm380_vm0, %v1524_v0  ;;  %1520 = vmatprep.subr.msk.bf16.mxu1 %vm380_vm0, %v1524_v0  ;;  %v382_v2 = vsel %vm380_vm0, %v1524_v0, 0  ;;  %v1529_v4 = vld [vmem:[%s1821_s0] sm:$0xff]   ;;  %v1527_v6 = vld [vmem:[%s1822_s1 + $0x8] sm:$0xff]   ;;  %v1533_v10 = vld [vmem:[%s1821_s0 + $0x10] sm:$0xff]  }
   0x3   :  { %1436 = vmatpush3.bf16.msra.mxu0 %v382_v2  ;;  %1514 = vmatpush3.bf16.msra.mxu1 %v382_v2  ;;  %v1530_v5 = vld [vmem:[%s1821_s0 + $0x80] sm:$0xff]   ;;  %v1531_v8 = vld [vmem:[%s1821_s0 + $0x8] sm:$0xff]   ;;  %v1534_v11 = vld [vmem:[%s1821_s0 + $0x90] sm:$0xff]  }
   0x4   :  { %1437 = vmatprep.subr.bf16.mxu0 %v1525_v1  ;;  %1510 = vmatprep.subr.bf16.mxu1 %v1525_v1  ;;  %v1528_v7 = vld [vmem:[%s1822_s1] sm:$0xff]   ;;  %v1532_v9 = vld [vmem:[%s1821_s0 + $0x88] sm:$0xff]   ;;  %v1535_v12 = vld [vmem:[%s1821_s0 + $0x18] sm:$0xff]  }
   0x5   :  { %1445 = vmatprep.mubr.msk.bf16.mxu0 %vm283_vm1, %v1529_v4  ;;  %1477 = vmatprep.mubr.msk.bf16.mxu1 %vm283_vm1, %v1530_v5  ;;  %v1536_v13 = vld [vmem:[%s1821_s0 + $0x98] sm:$0xff]   ;;  %v1537_v14 = vld [vmem:[%s1821_s0 + $0x20] sm:$0xff]   ;;  %v1539_v16 = vld [vmem:[%s1821_s0 + $0x28] sm:$0xff]  }
   0x6   :  { %v1538_v15 = vld [vmem:[%s1821_s0 + $0xa0] sm:$0xff]   ;;  %v1540_v17 = vld [vmem:[%s1821_s0 + $0xa8] sm:$0xff]   ;;  %v1541_v18 = vld [vmem:[%s1821_s0 + $0x30] sm:$0xff]  }
   0x7   :  { %1438 = vmatpush3.bf16.msra.mxu0 %v1525_v1  ;;  %1515 = vmatpush3.bf16.msra.mxu1 %v1525_v1  ;;  %v1542_v19 = vld [vmem:[%s1821_s0 + $0xb0] sm:$0xff]  }
   0x8   :  { %1439 = vmatprep.subr.bf16.mxu0 %v1526_v3  ;;  %1511 = vmatprep.subr.bf16.mxu1 %v1526_v3 }
   0xb   :  { %1440 = vmatpush3.bf16.msra.mxu0 %v1526_v3  ;;  %1516 = vmatpush3.bf16.msra.mxu1 %v1526_v3 }
   0xc   :  { %1441 = vmatprep.subr.bf16.mxu0 %v1527_v6  ;;  %1512 = vmatprep.subr.bf16.mxu1 %v1527_v6 }
   0xf   :  { %1442 = vmatpush3.bf16.msra.mxu0 %v1527_v6  ;;  %1517 = vmatpush3.bf16.msra.mxu1 %v1527_v6 }
  0x10   :  { %1443 = vmatprep.subr.bf16.mxu0 %v1528_v7  ;;  %1513 = vmatprep.subr.bf16.mxu1 %v1528_v7 }
  0x13   :  { %1444 = vmatpush3.bf16.msra.mxu0 %v1528_v7  ;;  %1518 = vmatpush3.bf16.msra.mxu1 %v1528_v7 }
  0x16   :  { %1446 = vmatmul.mubr.msk.bf16.vlgmr.msra.gmra.mxu0 %vm283_vm1, %v1531_v8  ;;  %1478 = vmatmul.mubr.msk.bf16.vlgmr.msra.gmra.mxu1 %vm283_vm1, %v1532_v9 }
  0x17   :  { %1449 = vmatprep.mubr.msk.bf16.mxu0 %vm283_vm1, %v1533_v10  ;;  %1481 = vmatprep.mubr.msk.bf16.mxu1 %vm283_vm1, %v1534_v11 }
  0x1e   :  { %1450 = vmatmul.mubr.msk.bf16.gmra.mxu0 %vm283_vm1, %v1535_v12  ;;  %1482 = vmatmul.mubr.msk.bf16.gmra.mxu1 %vm283_vm1, %v1536_v13 }
  0x1f   :  { %1453 = vmatprep.mubr.msk.bf16.mxu0 %vm283_vm1, %v1537_v14  ;;  %1485 = vmatprep.mubr.msk.bf16.mxu1 %vm283_vm1, %v1538_v15 }
  0x20   :  { %8 = vsyncpa [#allocation3], 0  ;;  %v1543_v20 = vld [vmem:[%s1821_s0 + $0x38] sm:$0xff]   ;;  %v1545_v22 = vld [vmem:[%s1821_s0 + $0x40] sm:$0xff]  }
  0x21   :  { %v1544_v21 = vld [vmem:[%s1821_s0 + $0xb8] sm:$0xff]   ;;  %v1546_v23 = vld [vmem:[%s1821_s0 + $0xc0] sm:$0xff]   ;;  %v1547_v24 = vld [vmem:[%s1821_s0 + $0x48] sm:$0xff]  }
  0x22   :  { %v1548_v25 = vld [vmem:[%s1821_s0 + $0xc8] sm:$0xff]   ;;  %v1549_v26 = vld [vmem:[%s1821_s0 + $0x50] sm:$0xff]   ;;  %v1551_v28 = vld [vmem:[%s1821_s0 + $0x58] sm:$0xff]  }
  0x23   :  { %v1550_v27 = vld [vmem:[%s1821_s0 + $0xd0] sm:$0xff]   ;;  %v1552_v29 = vld [vmem:[%s1821_s0 + $0xd8] sm:$0xff]   ;;  %v1553_v30 = vld [vmem:[%s1821_s0 + $0x60] sm:$0xff]  }
  0x24   :  { %v1554_v31 = vld [vmem:[%s1821_s0 + $0xe0] sm:$0xff]   ;;  %v1555_v32 = vld [vmem:[%s1821_s0 + $0x68] sm:$0xff]   ;;  %v1557_v34 = vld [vmem:[%s1821_s0 + $0x70] sm:$0xff]  }
  0x25   :  { %v1556_v33 = vld [vmem:[%s1821_s0 + $0xe8] sm:$0xff]   ;;  %v1558_v35 = vld [vmem:[%s1821_s0 + $0xf0] sm:$0xff]   ;;  %v1559_v36 = vld [vmem:[%s1821_s0 + $0x78] sm:$0xff]  }
  0x26   :  { %1454 = vmatmul.mubr.msk.bf16.gmra.mxu0 %vm283_vm1, %v1539_v16  ;;  %1486 = vmatmul.mubr.msk.bf16.gmra.mxu1 %vm283_vm1, %v1540_v17  ;;  %v1560_v37 = vld [vmem:[%s1821_s0 + $0xf8] sm:$0xff]   ;;  %v1752_v40 = vld [vmem:[%s1823_s2] ss:$0 sm:$0xff]  ;;  %s1583_s0 = smov [#allocation2]  }
  0x27   :  { %1457 = vmatprep.mubr.msk.bf16.mxu0 %vm283_vm1, %v1541_v18  ;;  %1489 = vmatprep.mubr.msk.bf16.mxu1 %vm283_vm1, %v1542_v19  ;;  %s998_s2 = sshll.u32 %s1583_s0, 4  ;;  %s999_s2 = int_to_ptr.vmem [resolvable:$true] %s998_s2 }
  0x28   :  { %s1561_s5 = scalar_lea.vmem %s999_s2, 4096  ;;  %p1566_p1 = scmp.lt.s32.totalorder %s999_s2, %s999_s2 }
  0x29   :  { %p1562_p0 = scmp.ne.s32.totalorder %s999_s2, %s1561_s5  ;;  %p1567_p2 = scmp.lt.s32.totalorder %s1561_s5, %s1561_s5 }
  0x2b   :  { %p1568_p3 = por %p1567_p2, %p1566_p1 }
  0x2d   :  { %p1569_p4 = pnand %p1568_p3, %p1562_p0 }
  0x2e   :  { %1458 = vmatmul.mubr.msk.bf16.gmra.mxu0 %vm283_vm1, %v1543_v20  ;;  %1490 = vmatmul.mubr.msk.bf16.gmra.mxu1 %vm283_vm1, %v1544_v21 }
  0x2f   :  { %1461 = vmatprep.mubr.msk.bf16.mxu0 %vm283_vm1, %v1545_v22  ;;  %1493 = vmatprep.mubr.msk.bf16.mxu1 %vm283_vm1, %v1546_v23 }
  0x36   :  { %1462 = vmatmul.mubr.msk.bf16.gmra.mxu0 %vm283_vm1, %v1547_v24  ;;  %1494 = vmatmul.mubr.msk.bf16.gmra.mxu1 %vm283_vm1, %v1548_v25 }
  0x37   :  { %1465 = vmatprep.mubr.msk.bf16.mxu0 %vm283_vm1, %v1549_v26  ;;  %1497 = vmatprep.mubr.msk.bf16.mxu1 %vm283_vm1, %v1550_v27 }
  0x3e   :  { %1466 = vmatmul.mubr.msk.bf16.gmra.mxu0 %vm283_vm1, %v1551_v28  ;;  %1498 = vmatmul.mubr.msk.bf16.gmra.mxu1 %vm283_vm1, %v1552_v29 }
  0x3f   :  { %1469 = vmatprep.mubr.msk.bf16.mxu0 %vm283_vm1, %v1553_v30  ;;  %1501 = vmatprep.mubr.msk.bf16.mxu1 %vm283_vm1, %v1554_v31 }
  0x46   :  { %1470 = vmatmul.mubr.msk.bf16.gmra.mxu0 %vm283_vm1, %v1555_v32  ;;  %1502 = vmatmul.mubr.msk.bf16.gmra.mxu1 %vm283_vm1, %v1556_v33 }
  0x47   :  { %1473 = vmatprep.mubr.msk.bf16.mxu0 %vm283_vm1, %v1557_v34  ;;  %1505 = vmatprep.mubr.msk.bf16.mxu1 %vm283_vm1, %v1558_v35 }
  0x4e   :  { %1474 = vmatmul.mubr.msk.bf16.gmra.mxu0 %vm283_vm1, %v1559_v36  ;;  %1506 = vmatmul.mubr.msk.bf16.gmra.mxu1 %vm283_vm1, %v1560_v37 }
  0xd6   :  { %v1447_v38 = vpop.f32.mrf.mxu0  ;;  %v1479_v39 = vpop.f32.mrf.mxu1 }
  0xd7   :  { %v427_v45 = vadd.f32 %v1447_v38, %v1752_v40  ;;  %v555_v46 = vadd.f32 %v1479_v39, %v1752_v40 }
  0xd8   :  { %v418_v41 = vpop.f32.mrf.mxu0  ;;  %v546_v42 = vpop.f32.mrf.mxu1 }
  0xd9   :  { %v419_v49 = vadd.f32 %v1752_v40, %v418_v41  ;;  %v547_v50 = vadd.f32 %v1752_v40, %v546_v42 }
  0xda   :  { %v1448_v43 = vpop.f32.mrf.mxu0  ;;  %v1480_v44 = vpop.f32.mrf.mxu1 }
  0xdb   :  { %v430_v47 = vadd.f32 %v1448_v43, %v1752_v40  ;;  %v558_v48 = vadd.f32 %v1480_v44, %v1752_v40 }
  0xdc   :  { %v421_v51 = vpop.f32.mrf.mxu0  ;;  %v549_v52 = vpop.f32.mrf.mxu1 }
  0xdd   :  { %v1215_v53 = vpack.c.bf16 %v430_v47, %v427_v45  ;;  %v1295_v54 = vpack.c.bf16 %v558_v48, %v555_v46  ;;  %v422_v55 = vadd.f32 %v1752_v40, %v421_v51  ;;  %v550_v56 = vadd.f32 %v1752_v40, %v549_v52 }
  0xde   :  { %v1451_v57 = vpop.f32.mrf.mxu0  ;;  %v1483_v58 = vpop.f32.mrf.mxu1 }
  0xdf   :  { %1367 = vst [vmem:[#allocation2 + $0x8] sm:$0xff] %v1215_v53   ;;  %1383 = vst [vmem:[#allocation2 + $0x88] sm:$0xff] %v1295_v54   ;;  %v1210_v59 = vpack.c.bf16 %v422_v55, %v419_v49  ;;  %v1290_v60 = vpack.c.bf16 %v550_v56, %v547_v50  ;;  %v443_v1 = vadd.f32 %v1451_v57, %v1752_v40 }
  0xe0   :  { %v434_v61 = vpop.f32.mrf.mxu0  ;;  %v562_v62 = vpop.f32.mrf.mxu1  ;;  %v571_v2 = vadd.f32 %v1483_v58, %v1752_v40 }
  0xe1   :  { %1211 = vst [vmem:[#allocation2] sm:$0xff] %v1210_v59   ;;  %1382 = vst [vmem:[#allocation2 + $0x80] sm:$0xff] %v1290_v60   ;;  %v435_v5 = vadd.f32 %v1752_v40, %v434_v61  ;;  %v563_v6 = vadd.f32 %v1752_v40, %v562_v62 }
  0xe2   :  { %v1452_v63 = vpop.f32.mrf.mxu0  ;;  %v1484_v0 = vpop.f32.mrf.mxu1 }
  0xe3   :  { %v446_v3 = vadd.f32 %v1452_v63, %v1752_v40  ;;  %v574_v4 = vadd.f32 %v1484_v0, %v1752_v40 }
  0xe4   :  { %v437_v7 = vpop.f32.mrf.mxu0  ;;  %v565_v8 = vpop.f32.mrf.mxu1 }
  0xe5   :  { %v1225_v9 = vpack.c.bf16 %v446_v3, %v443_v1  ;;  %v1305_v10 = vpack.c.bf16 %v574_v4, %v571_v2  ;;  %v438_v11 = vadd.f32 %v1752_v40, %v437_v7  ;;  %v566_v12 = vadd.f32 %v1752_v40, %v565_v8 }
  0xe6   :  { %v1455_v13 = vpop.f32.mrf.mxu0  ;;  %v1487_v14 = vpop.f32.mrf.mxu1 }
  0xe7   :  { %1369 = vst [vmem:[#allocation2 + $0x18] sm:$0xff] %v1225_v9   ;;  %1385 = vst [vmem:[#allocation2 + $0x98] sm:$0xff] %v1305_v10   ;;  %v1220_v15 = vpack.c.bf16 %v438_v11, %v435_v5  ;;  %v1300_v16 = vpack.c.bf16 %v566_v12, %v563_v6  ;;  %v459_v21 = vadd.f32 %v1455_v13, %v1752_v40 }
  0xe8   :  { %v450_v17 = vpop.f32.mrf.mxu0  ;;  %v578_v18 = vpop.f32.mrf.mxu1  ;;  %v587_v22 = vadd.f32 %v1487_v14, %v1752_v40 }
  0xe9   :  { %1368 = vst [vmem:[#allocation2 + $0x10] sm:$0xff] %v1220_v15   ;;  %1384 = vst [vmem:[#allocation2 + $0x90] sm:$0xff] %v1300_v16   ;;  %v451_v25 = vadd.f32 %v1752_v40, %v450_v17  ;;  %v579_v26 = vadd.f32 %v1752_v40, %v578_v18 }
  0xea   :  { %v1456_v19 = vpop.f32.mrf.mxu0  ;;  %v1488_v20 = vpop.f32.mrf.mxu1 }
  0xeb   :  { %v462_v23 = vadd.f32 %v1456_v19, %v1752_v40  ;;  %v590_v24 = vadd.f32 %v1488_v20, %v1752_v40 }
  0xec   :  { %v453_v27 = vpop.f32.mrf.mxu0  ;;  %v581_v28 = vpop.f32.mrf.mxu1 }
  0xed   :  { %v1235_v29 = vpack.c.bf16 %v462_v23, %v459_v21  ;;  %v1315_v30 = vpack.c.bf16 %v590_v24, %v587_v22  ;;  %v454_v31 = vadd.f32 %v1752_v40, %v453_v27  ;;  %v582_v32 = vadd.f32 %v1752_v40, %v581_v28 }
  0xee   :  { %v1459_v33 = vpop.f32.mrf.mxu0  ;;  %v1491_v34 = vpop.f32.mrf.mxu1 }
  0xef   :  { %1371 = vst [vmem:[#allocation2 + $0x28] sm:$0xff] %v1235_v29   ;;  %1387 = vst [vmem:[#allocation2 + $0xa8] sm:$0xff] %v1315_v30   ;;  %v1230_v35 = vpack.c.bf16 %v454_v31, %v451_v25  ;;  %v1310_v36 = vpack.c.bf16 %v582_v32, %v579_v26  ;;  %v475_v42 = vadd.f32 %v1459_v33, %v1752_v40 }
  0xf0   :  { %v466_v37 = vpop.f32.mrf.mxu0  ;;  %v594_v38 = vpop.f32.mrf.mxu1  ;;  %v603_v43 = vadd.f32 %v1491_v34, %v1752_v40 }
  0xf1   :  { %1370 = vst [vmem:[#allocation2 + $0x20] sm:$0xff] %v1230_v35   ;;  %1386 = vst [vmem:[#allocation2 + $0xa0] sm:$0xff] %v1310_v36   ;;  %v467_v46 = vadd.f32 %v1752_v40, %v466_v37  ;;  %v595_v47 = vadd.f32 %v1752_v40, %v594_v38 }
  0xf2   :  { %v1460_v39 = vpop.f32.mrf.mxu0  ;;  %v1492_v41 = vpop.f32.mrf.mxu1 }
  0xf3   :  { %v478_v44 = vadd.f32 %v1460_v39, %v1752_v40  ;;  %v606_v45 = vadd.f32 %v1492_v41, %v1752_v40 }
  0xf4   :  { %v469_v48 = vpop.f32.mrf.mxu0  ;;  %v597_v49 = vpop.f32.mrf.mxu1 }
  0xf5   :  { %v1245_v50 = vpack.c.bf16 %v478_v44, %v475_v42  ;;  %v1325_v51 = vpack.c.bf16 %v606_v45, %v603_v43  ;;  %v470_v52 = vadd.f32 %v1752_v40, %v469_v48  ;;  %v598_v53 = vadd.f32 %v1752_v40, %v597_v49 }
  0xf6   :  { %v1463_v54 = vpop.f32.mrf.mxu0  ;;  %v1495_v55 = vpop.f32.mrf.mxu1 }
  0xf7   :  { %1373 = vst [vmem:[#allocation2 + $0x38] sm:$0xff] %v1245_v50   ;;  %1389 = vst [vmem:[#allocation2 + $0xb8] sm:$0xff] %v1325_v51   ;;  %v1240_v56 = vpack.c.bf16 %v470_v52, %v467_v46  ;;  %v1320_v57 = vpack.c.bf16 %v598_v53, %v595_v47  ;;  %v491_v62 = vadd.f32 %v1463_v54, %v1752_v40 }
  0xf8   :  { %v482_v58 = vpop.f32.mrf.mxu0  ;;  %v610_v59 = vpop.f32.mrf.mxu1  ;;  %v619_v63 = vadd.f32 %v1495_v55, %v1752_v40 }
  0xf9   :  { %1372 = vst [vmem:[#allocation2 + $0x30] sm:$0xff] %v1240_v56   ;;  %1388 = vst [vmem:[#allocation2 + $0xb0] sm:$0xff] %v1320_v57   ;;  %v483_v2 = vadd.f32 %v1752_v40, %v482_v58  ;;  %v611_v3 = vadd.f32 %v1752_v40, %v610_v59 }
  0xfa   :  { %v1464_v60 = vpop.f32.mrf.mxu0  ;;  %v1496_v61 = vpop.f32.mrf.mxu1 }
  0xfb   :  { %v494_v0 = vadd.f32 %v1464_v60, %v1752_v40  ;;  %v622_v1 = vadd.f32 %v1496_v61, %v1752_v40 }
  0xfc   :  { %v485_v4 = vpop.f32.mrf.mxu0  ;;  %v613_v5 = vpop.f32.mrf.mxu1 }
  0xfd   :  { %v1255_v6 = vpack.c.bf16 %v494_v0, %v491_v62  ;;  %v1335_v7 = vpack.c.bf16 %v622_v1, %v619_v63  ;;  %v486_v8 = vadd.f32 %v1752_v40, %v485_v4  ;;  %v614_v9 = vadd.f32 %v1752_v40, %v613_v5 }
  0xfe   :  { %v1467_v10 = vpop.f32.mrf.mxu0  ;;  %v1499_v11 = vpop.f32.mrf.mxu1 }
  0xff   :  { %1375 = vst [vmem:[#allocation2 + $0x48] sm:$0xff] %v1255_v6   ;;  %1391 = vst [vmem:[#allocation2 + $0xc8] sm:$0xff] %v1335_v7   ;;  %v1250_v12 = vpack.c.bf16 %v486_v8, %v483_v2  ;;  %v1330_v13 = vpack.c.bf16 %v614_v9, %v611_v3  ;;  %v507_v18 = vadd.f32 %v1467_v10, %v1752_v40 }
 0x100   :  { %v498_v14 = vpop.f32.mrf.mxu0  ;;  %v626_v15 = vpop.f32.mrf.mxu1  ;;  %v635_v19 = vadd.f32 %v1499_v11, %v1752_v40 }
 0x101   :  { %1374 = vst [vmem:[#allocation2 + $0x40] sm:$0xff] %v1250_v12   ;;  %1390 = vst [vmem:[#allocation2 + $0xc0] sm:$0xff] %v1330_v13   ;;  %v499_v22 = vadd.f32 %v1752_v40, %v498_v14  ;;  %v627_v23 = vadd.f32 %v1752_v40, %v626_v15 }
 0x102   :  { %v1468_v16 = vpop.f32.mrf.mxu0  ;;  %v1500_v17 = vpop.f32.mrf.mxu1 }
 0x103   :  { %v510_v20 = vadd.f32 %v1468_v16, %v1752_v40  ;;  %v638_v21 = vadd.f32 %v1500_v17, %v1752_v40 }
 0x104   :  { %v501_v24 = vpop.f32.mrf.mxu0  ;;  %v629_v25 = vpop.f32.mrf.mxu1 }
 0x105   :  { %v1265_v26 = vpack.c.bf16 %v510_v20, %v507_v18  ;;  %v1345_v27 = vpack.c.bf16 %v638_v21, %v635_v19  ;;  %v502_v28 = vadd.f32 %v1752_v40, %v501_v24  ;;  %v630_v29 = vadd.f32 %v1752_v40, %v629_v25 }
 0x106   :  { %v1471_v30 = vpop.f32.mrf.mxu0  ;;  %v1503_v31 = vpop.f32.mrf.mxu1 }
 0x107   :  { %1377 = vst [vmem:[#allocation2 + $0x58] sm:$0xff] %v1265_v26   ;;  %1393 = vst [vmem:[#allocation2 + $0xd8] sm:$0xff] %v1345_v27   ;;  %v1260_v32 = vpack.c.bf16 %v502_v28, %v499_v22  ;;  %v1340_v33 = vpack.c.bf16 %v630_v29, %v627_v23  ;;  %v523_v38 = vadd.f32 %v1471_v30, %v1752_v40 }
 0x108   :  { %v514_v34 = vpop.f32.mrf.mxu0  ;;  %v642_v35 = vpop.f32.mrf.mxu1  ;;  %v651_v39 = vadd.f32 %v1503_v31, %v1752_v40 }
 0x109   :  { %1376 = vst [vmem:[#allocation2 + $0x50] sm:$0xff] %v1260_v32   ;;  %1392 = vst [vmem:[#allocation2 + $0xd0] sm:$0xff] %v1340_v33   ;;  %v515_v43 = vadd.f32 %v1752_v40, %v514_v34  ;;  %v643_v44 = vadd.f32 %v1752_v40, %v642_v35 }
 0x10a   :  { %v1472_v36 = vpop.f32.mrf.mxu0  ;;  %v1504_v37 = vpop.f32.mrf.mxu1 }
 0x10b   :  { %v526_v41 = vadd.f32 %v1472_v36, %v1752_v40  ;;  %v654_v42 = vadd.f32 %v1504_v37, %v1752_v40 }
 0x10c   :  { %v517_v45 = vpop.f32.mrf.mxu0  ;;  %v645_v46 = vpop.f32.mrf.mxu1 }
 0x10d   :  { %v1275_v47 = vpack.c.bf16 %v526_v41, %v523_v38  ;;  %v1355_v48 = vpack.c.bf16 %v654_v42, %v651_v39  ;;  %v518_v49 = vadd.f32 %v1752_v40, %v517_v45  ;;  %v646_v50 = vadd.f32 %v1752_v40, %v645_v46 }
 0x10e   :  { %v1475_v51 = vpop.f32.mrf.mxu0  ;;  %v1507_v52 = vpop.f32.mrf.mxu1 }
 0x10f   :  { %1379 = vst [vmem:[#allocation2 + $0x68] sm:$0xff] %v1275_v47   ;;  %1395 = vst [vmem:[#allocation2 + $0xe8] sm:$0xff] %v1355_v48   ;;  %v1270_v53 = vpack.c.bf16 %v518_v49, %v515_v43  ;;  %v1350_v54 = vpack.c.bf16 %v646_v50, %v643_v44  ;;  %v539_v59 = vadd.f32 %v1475_v51, %v1752_v40 }
 0x110   :  { %v530_v55 = vpop.f32.mrf.mxu0  ;;  %v658_v56 = vpop.f32.mrf.mxu1  ;;  %v667_v60 = vadd.f32 %v1507_v52, %v1752_v40 }
 0x111   :  { %1378 = vst [vmem:[#allocation2 + $0x60] sm:$0xff] %v1270_v53   ;;  %1394 = vst [vmem:[#allocation2 + $0xe0] sm:$0xff] %v1350_v54   ;;  %v531_v63 = vadd.f32 %v1752_v40, %v530_v55  ;;  %v659_v0 = vadd.f32 %v1752_v40, %v658_v56 }
 0x112   :  { %v1476_v57 = vpop.f32.mrf.mxu0  ;;  %v1508_v58 = vpop.f32.mrf.mxu1 }
 0x113   :  { %v542_v61 = vadd.f32 %v1476_v57, %v1752_v40  ;;  %v670_v62 = vadd.f32 %v1508_v58, %v1752_v40 }
 0x114   :  { %v533_v1 = vpop.f32.mrf.mxu0  ;;  %v661_v2 = vpop.f32.mrf.mxu1 }
 0x115   :  { %v1285_v3 = vpack.c.bf16 %v542_v61, %v539_v59  ;;  %v1365_v4 = vpack.c.bf16 %v670_v62, %v667_v60  ;;  %v534_v5 = vadd.f32 %v1752_v40, %v533_v1  ;;  %v662_v6 = vadd.f32 %v1752_v40, %v661_v2 }
 0x117   :  { %1381 = vst [vmem:[#allocation2 + $0x78] sm:$0xff] %v1285_v3   ;;  %1397 = vst [vmem:[#allocation2 + $0xf8] sm:$0xff] %v1365_v4   ;;  %v1280_v7 = vpack.c.bf16 %v534_v5, %v531_v63  ;;  %v1360_v8 = vpack.c.bf16 %v662_v6, %v659_v0 }
 0x119   :  { %1380 = vst [vmem:[#allocation2 + $0x70] sm:$0xff] %v1280_v7   ;;  %1396 = vst [vmem:[#allocation2 + $0xf0] sm:$0xff] %v1360_v8  }
 0x11a   :  { %1572 = shalt.err (!%p1569_p4)
}
 0x11b   :  { %s1584_s1 = smov 64   ;;  %s1585_s6 = smov 4  }
 0x11c   :  { %1004 = dma.vmem_to_hbm [thread:$0]  %s999_s2, 4096, %s1824_s3, [#allocation3], %s1584_s1, %s1584_s1, %s1585_s6  }
 0x11d   :  { %1581 = dma.done.wait [#allocation3], 4096  }
 0x11e   :  { %1582 = vsyncadd [#allocation3], 4294963200 }
 0x11f   :  { %1008 = vsyncpa [#allocation3], 1 }

</bundles_post_ra>
